<compile_context>
chip_gen: v7x
topology: tpu7x:2x2x1
jax: 0.10.0
libtpu: 0.0.40
codegen_flags: <defaults>
</compile_context>

<pallas_src>
import jax
import jax.numpy as jnp
from jax.experimental import pallas as pl
from jax.experimental.pallas import tpu as pltpu


EPS = 1e-5  # matches the PyTorch module


def _biasfree_ln_kernel(x_ref, w_ref, o_ref):
    # x_ref: (TM, C) activation tile, w_ref: (1, C) resident weight, o_ref: (TM, C)
    x = x_ref[...].astype(jnp.float32)
    c = x.shape[-1]
    inv_c = 1.0 / c
    # One-pass biased variance: E[x^2] - E[x]^2  (== torch.var(unbiased=False)).
    s1 = jnp.sum(x, axis=-1, keepdims=True)
    s2 = jnp.sum(x * x, axis=-1, keepdims=True)
    mean = s1 * inv_c
    var = jnp.maximum(s2 * inv_c - mean * mean, 0.0)   # clamp cancellation noise
    inv_std = jax.lax.rsqrt(var + EPS)                 # EUP rsqrt, not sqrt+div
    # NOTE: PyTorch divides x (not x - mean) by sqrt(var + eps).
    o_ref[...] = (x * inv_std * w_ref[...]).astype(o_ref.dtype)


def _pick_row_tile(n, c, itemsize, block_rows):
    """Choose the row-tile size TM and the (possibly padded) row count."""
    if n <= 8:
        return n, n  # single full block; (n, C) equals the array dims
    # VMEM footprint per step: double-buffered input + output tiles, with the
    # lane dim padded up to a multiple of 128 in VMEM.
    padded_c = pl.cdiv(c, 128) * 128
    per_row = 4 * padded_c * itemsize                    # 2 in bufs + 2 out bufs
    budget = 24 * 1024 * 1024                            # keeps v7x (64 MiB) happy
    tm_cap = max(8, (budget // per_row) // 8 * 8)
    tm_cap = min(tm_cap, block_rows)
    # Keep at least 2 grid steps so the "parallel" axis can span both v7x TCs.
    if n >= 16:
        tm_cap = min(tm_cap, max(8, (n // 2) // 8 * 8))
    tm_cap = max(8, tm_cap - tm_cap % 8)
    # Prefer a divisor of n (multiple of 8): no jnp.pad / out[:N] HBM copies.
    for d in range(tm_cap, 7, -8):
        if n % d == 0:
            return d, n
    # Ragged fallback: pad (zero rows -> var=0 -> finite rsqrt, sliced off).
    n_pad = int(pl.cdiv(n, tm_cap)) * tm_cap
    return tm_cap, n_pad


def biasfree_layernorm(x, weight, *, block_rows=4096):
    """x: (..., C), weight: (C,). Normalizes over the last dim."""
    orig_shape = x.shape
    C = orig_shape[-1]
    x2 = x.reshape(-1, C)
    N = x2.shape[0]
    itemsize = jnp.dtype(x.dtype).itemsize

    tm, n_pad = _pick_row_tile(N, C, itemsize, block_rows)
    if n_pad != N:
        x2 = jnp.pad(x2, ((0, n_pad - N), (0, 0)))

    # Explicit scoped-VMEM limit: covers the double-buffered tiles with
    # headroom (v5e default is only 16 MiB; v7x physical is 64 MiB).
    padded_c = int(pl.cdiv(C, 128)) * 128
    footprint = 4 * tm * padded_c * itemsize + 4 * padded_c * 4
    vmem_limit = int(min(64 * 1024 * 1024,
                         max(footprint + (8 << 20), 16 << 20)))

    out = pl.pallas_call(
        _biasfree_ln_kernel,
        out_shape=jax.ShapeDtypeStruct((n_pad, C), x.dtype),
        grid=(n_pad // tm,),
        in_specs=[
            pl.BlockSpec((tm, C), lambda i: (i, 0)),   # row tile of activations
            pl.BlockSpec((1, C), lambda i: (0, 0)),    # weight, resident across steps
        ],
        out_specs=pl.BlockSpec((tm, C), lambda i: (i, 0)),
        compiler_params=pltpu.CompilerParams(
            dimension_semantics=("parallel",),
            vmem_limit_bytes=vmem_limit,
        ),
    )(x2, weight.reshape(1, C).astype(jnp.float32))   # keep the f32 parameter

    if n_pad != N:
        out = out[:N]
    return out.reshape(orig_shape)


# ---------------- pure-JAX reference (same math, no Pallas) ----------------
def biasfree_layernorm_ref(x, weight):
    var = jnp.var(x.astype(jnp.float32), axis=-1, keepdims=True)  # ddof=0
    y = x.astype(jnp.float32) / jnp.sqrt(var + EPS) * weight.astype(jnp.float32)
    return y.astype(x.dtype)


if __name__ == "__main__":
    key = jax.random.PRNGKey(0)
    k1, k2 = jax.random.split(key, 2)

    # Restormer-style usage: (B, H*W, C) with the channel dim normalized.
    B, L, C = 2, 256, 48          # batch=2, 16x16 spatial tokens, 48 channels
    x = jax.random.normal(k1, (B, L, C), jnp.float32)
    weight = 1.0 + 0.05 * jax.random.normal(k2, (C,), jnp.float32)

    y = biasfree_layernorm(x, weight)
    y = jax.block_until_ready(y)

    y_ref = biasfree_layernorm_ref(x, weight)
    assert y.shape == x.shape
    err = float(jnp.max(jnp.abs(y - y_ref)))
    assert jnp.allclose(y, y_ref, rtol=1e-4, atol=1e-5), err

    print("KERNEL_OK")
</pallas_src>

<mosaic_0001>
module attributes {stable_mosaic.version = 11 : i64} {
  func.func @_biasfree_ln_kernel(%arg0: i32, %arg1: memref<256x48xf32, #tpu.memory_space<vmem>>, %arg2: memref<1x48xf32, #tpu.memory_space<vmem>>, %arg3: memref<256x48xf32, #tpu.memory_space<vmem>>) attributes {dimension_semantics = [#tpu.dimension_semantics<parallel>], iteration_bounds = array<i64: 2>, scalar_prefetch = 0 : i64, scratch_operands = 0 : i64, tpu.core_type = #tpu.core_type<tc>, window_params = [{transform_indices = @transform_0, window_bounds = array<i64: 256, 48>}, {pipeline_mode = #tpu.pipeline_mode<synchronous>, transform_indices = @transform_1, window_bounds = array<i64: 1, 48>}, {transform_indices = @transform_2, window_bounds = array<i64: 256, 48>}]} {
    %c0 = arith.constant 0 : index
    %c0_0 = arith.constant 0 : index
    %0 = vector.load %arg1[%c0, %c0_0] : memref<256x48xf32, #tpu.memory_space<vmem>>, vector<256x48xf32>
    %cst = arith.constant dense<0.000000e+00> : vector<256xf32>
    %1 = vector.multi_reduction <add>, %0, %cst [1] : vector<256x48xf32> to vector<256xf32>
    %2 = vector.shape_cast %1 : vector<256xf32> to vector<256x1xf32>
    %3 = arith.mulf %0, %0 : vector<256x48xf32>
    %cst_1 = arith.constant dense<0.000000e+00> : vector<256xf32>
    %4 = vector.multi_reduction <add>, %3, %cst_1 [1] : vector<256x48xf32> to vector<256xf32>
    %5 = vector.shape_cast %4 : vector<256xf32> to vector<256x1xf32>
    %cst_2 = arith.constant 0.020833334 : f32
    %6 = vector.broadcast %cst_2 : f32 to vector<256x1xf32>
    %7 = arith.mulf %2, %6 : vector<256x1xf32>
    %cst_3 = arith.constant 0.020833334 : f32
    %8 = vector.broadcast %cst_3 : f32 to vector<256x1xf32>
    %9 = arith.mulf %5, %8 : vector<256x1xf32>
    %10 = arith.mulf %7, %7 : vector<256x1xf32>
    %11 = arith.subf %9, %10 : vector<256x1xf32>
    %cst_4 = arith.constant 0.000000e+00 : f32
    %12 = vector.broadcast %cst_4 : f32 to vector<256x1xf32>
    %13 = arith.maximumf %11, %12 : vector<256x1xf32>
    %cst_5 = arith.constant 9.99999974E-6 : f32
    %14 = vector.broadcast %cst_5 : f32 to vector<256x1xf32>
    %15 = arith.addf %13, %14 : vector<256x1xf32>
    %16 = math.rsqrt %15 : vector<256x1xf32>
    %17 = vector.broadcast %16 : vector<256x1xf32> to vector<256x48xf32>
    %18 = arith.mulf %0, %17 : vector<256x48xf32>
    %c0_6 = arith.constant 0 : index
    %c0_7 = arith.constant 0 : index
    %19 = vector.load %arg2[%c0_6, %c0_7] : memref<1x48xf32, #tpu.memory_space<vmem>>, vector<1x48xf32>
    %20 = vector.broadcast %19 : vector<1x48xf32> to vector<256x48xf32>
    %21 = arith.mulf %18, %20 : vector<256x48xf32>
    %c0_8 = arith.constant 0 : index
    %c0_9 = arith.constant 0 : index
    %22 = vector.load %arg3[%c0_8, %c0_9] : memref<256x48xf32, #tpu.memory_space<vmem>>, vector<256x48xf32>
    tpu.vector_store %arg3[%c0_8, %c0_9], %21 {strides = array<i32>} : memref<256x48xf32, #tpu.memory_space<vmem>>, vector<256x48xf32>,
    return
  }
  func.func @transform_0(%arg0: i32) -> (i32, i32) {
    %c0_i32 = arith.constant 0 : i32
    %c0_i32_0 = arith.constant 0 : i32
    return %arg0, %c0_i32 : i32, i32
  }
  func.func @transform_1(%arg0: i32) -> (i32, i32) {
    %c0_i32 = arith.constant 0 : i32
    %c0_i32_0 = arith.constant 0 : i32
    %c0_i32_1 = arith.constant 0 : i32
    return %c0_i32, %c0_i32_0 : i32, i32
  }
  func.func @transform_2(%arg0: i32) -> (i32, i32) {
    %c0_i32 = arith.constant 0 : i32
    %c0_i32_0 = arith.constant 0 : i32
    return %arg0, %c0_i32 : i32, i32
  }
}

</mosaic_0001>

<bundles_post_ra>
// kernel: tpu_custom_call.1
= control target key start
LH: loop header
LB: loop body
LE: loop exit
PB: predicated region body
PF: predicated region fallthrough
CT: control target
= control target key end

     0   :  { %s899_s9 = smov 0   ;;  %s1424_s0 = inlined_call_operand.vmem [shape: f32[512,48], index: 0, kind: input, shape index: {}]   ;;  %s1425_s1 = inlined_call_operand.vmem [shape: f32[1,48], index: 1, kind: input, shape index: {}]   ;;  %s1426_s2 = inlined_call_operand.vmem [shape: f32[512,48], index: 2, kind: output, shape index: {}]  }
   0x1 LB: > { %s787_s10 = sadd.s32 4294967295, %s882_s9   ;;  %p791_p0 = scmp.ge.s32.totalorder %s882_s9, 1  ;;  %s882_s9 = sphi %s899_s9, %s12_s9  }
   0x2   : > { %p113_p1 = scmp.lt.s32.totalorder %s882_s9, 3 }
   0x4   : > { %p114_p2 = pnand %p791_p0, %p113_p1 }
   0x6   : > { %117 = sbr.rel (%p114_p2) target bundleno = 312 (0x138), region = 28 }
   0xd   : > { %s792_s11 = sshll.u32 %s787_s10, 5  ;;  %vm179_vm0 = vcmask 392192  }
   0xe   : > { %p136_p3 = scmp.lt.s32.totalorder %s792_s11, 63 }
  0x10   : > { %s1475_s11 = smov (!%p136_p3, %s792_s11), 63 }
  0x11   : > { %s793_s12 = sshll.u32 %s1475_s11, 3 }
  0x12   : > { %s915_s15 = scalar_lea.vmem %s1424_s0, %s793_s12  ;;  %s1252_s20 = scalar_lea.vmem %s1426_s2, %s793_s12 }
  0x13   : > { %v918_v0 = vld [vmem:[%s915_s15 + $0x10] sm:$0xff]  ;;  %v921_v1 = vld [vmem:[%s915_s15] sm:$0xff]  ;;  %v924_v2 = vld [vmem:[%s915_s15 + $0x18] sm:$0xff] }
  0x14   : > { %v186_v3 = vsel %vm179_vm0, %v918_v0, 0.0  ;;  %v180_v4 = vsel %vm179_vm0, %v921_v1, 0.0  ;;  %v931_v5 = vld [vmem:[%s915_s15 + $0x8] sm:$0xff]  ;;  %v189_v6 = vsel %vm179_vm0, %v924_v2, 0.0  ;;  %v941_v9 = vld [vmem:[%s915_s15 + $0x20] sm:$0xff]  ;;  %v948_v12 = vld [vmem:[%s915_s15 + $0x38] sm:$0xff] }
  0x15   : > { %187 = vadd.xlane.f32.xlu1 %v186_v3  ;;  %181 = vadd.xlane.f32.xlu0 %v180_v4  ;;  %v183_v7 = vsel %vm179_vm0, %v931_v5, 0.0  ;;  %v938_v8 = vld [vmem:[%s915_s15 + $0x28] sm:$0xff]  ;;  %v192_v11 = vsel %vm179_vm0, %v941_v9, 0.0  ;;  %v951_v13 = vld [vmem:[%s915_s15 + $0x30] sm:$0xff]  ;;  %v201_v14 = vsel %vm179_vm0, %v948_v12, 0.0  ;;  %v961_v17 = vld [vmem:[%s915_s15 + $0x40] sm:$0xff]  ;;  %v277_v3 = vmul.f32 %v931_v5, %v931_v5 }
  0x16   : > { %v195_v10 = vsel %vm179_vm0, %v938_v8, 0.0  ;;  %v198_v15 = vsel %vm179_vm0, %v951_v13, 0.0  ;;  %v958_v16 = vld [vmem:[%s915_s15 + $0x48] sm:$0xff]  ;;  %v204_v19 = vsel %vm179_vm0, %v961_v17, 0.0  ;;  %v968_v20 = vld [vmem:[%s915_s15 + $0x58] sm:$0xff]  ;;  %v971_v21 = vld [vmem:[%s915_s15 + $0x50] sm:$0xff]  ;;  %v276_v4 = vmul.f32 %v921_v1, %v921_v1 }
  0x17   : > { %v207_v18 = vsel %vm179_vm0, %v958_v16, 0.0  ;;  %v213_v22 = vsel %vm179_vm0, %v968_v20, 0.0  ;;  %v210_v23 = vsel %vm179_vm0, %v971_v21, 0.0  ;;  %v978_v24 = vld [vmem:[%s915_s15 + $0x68] sm:$0xff]  ;;  %v981_v25 = vld [vmem:[%s915_s15 + $0x60] sm:$0xff]  ;;  %v988_v28 = vld [vmem:[%s915_s15 + $0x78] sm:$0xff] }
  0x18   : > { %v219_v26 = vsel %vm179_vm0, %v978_v24, 0.0  ;;  %v216_v27 = vsel %vm179_vm0, %v981_v25, 0.0  ;;  %1440 = vst [vmem:[#allocation2_spill] sm:$0xff] %v988_v28  ;;  %v991_v29 = vld [vmem:[%s915_s15 + $0x70] sm:$0xff]  ;;  %v225_v30 = vsel %vm179_vm0, %v988_v28, 0.0  ;;  %v998_v32 = vld [vmem:[%s915_s15 + $0x88] sm:$0xff] }
  0x19   : > { %190 = vadd.xlane.f32.xlu1 %v189_v6  ;;  %184 = vadd.xlane.f32.xlu0 %v183_v7  ;;  %1441 = vst [vmem:[#allocation3_spill] sm:$0xff] %v991_v29  ;;  %v222_v31 = vsel %vm179_vm0, %v991_v29, 0.0  ;;  %1442 = vst [vmem:[#allocation4_spill] sm:$0xff] %v998_v32  ;;  %v1001_v33 = vld [vmem:[%s915_s15 + $0x80] sm:$0xff]  ;;  %v231_v34 = vsel %vm179_vm0, %v998_v32, 0.0  ;;  %v1008_v36 = vld [vmem:[%s915_s15 + $0x98] sm:$0xff] }
  0x1a   : > { %1443 = vst [vmem:[#allocation5_spill] sm:$0xff] %v1001_v33  ;;  %v228_v35 = vsel %vm179_vm0, %v1001_v33, 0.0  ;;  %1444 = vst [vmem:[#allocation6_spill] sm:$0xff] %v1008_v36  ;;  %v1011_v37 = vld [vmem:[%s915_s15 + $0x90] sm:$0xff]  ;;  %v237_v38 = vsel %vm179_vm0, %v1008_v36, 0.0  ;;  %v1018_v40 = vld [vmem:[%s915_s15 + $0xa8] sm:$0xff] }
  0x1b   : > { %1445 = vst [vmem:[#allocation7_spill] sm:$0xff] %v1011_v37  ;;  %v234_v39 = vsel %vm179_vm0, %v1011_v37, 0.0  ;;  %1446 = vst [vmem:[#allocation8_spill] sm:$0xff] %v1018_v40  ;;  %v1021_v41 = vld [vmem:[%s915_s15 + $0xa0] sm:$0xff]  ;;  %v243_v42 = vsel %vm179_vm0, %v1018_v40, 0.0  ;;  %v1028_v44 = vld [vmem:[%s915_s15 + $0xb8] sm:$0xff] }
  0x1c   : > { %1447 = vst [vmem:[#allocation9_spill] sm:$0xff] %v1021_v41  ;;  %v240_v43 = vsel %vm179_vm0, %v1021_v41, 0.0  ;;  %1448 = vst [vmem:[#allocation10_spill] sm:$0xff] %v1028_v44  ;;  %v1031_v45 = vld [vmem:[%s915_s15 + $0xb0] sm:$0xff]  ;;  %v249_v46 = vsel %vm179_vm0, %v1028_v44, 0.0  ;;  %v1038_v48 = vld [vmem:[%s915_s15 + $0xc8] sm:$0xff] }
  0x1d   : > { %196 = vadd.xlane.f32.xlu1 %v195_v10  ;;  %193 = vadd.xlane.f32.xlu0 %v192_v11  ;;  %1449 = vst [vmem:[#allocation11_spill] sm:$0xff] %v1031_v45  ;;  %v246_v47 = vsel %vm179_vm0, %v1031_v45, 0.0  ;;  %1450 = vst [vmem:[#allocation12_spill] sm:$0xff] %v1038_v48  ;;  %v1041_v49 = vld [vmem:[%s915_s15 + $0xc0] sm:$0xff]  ;;  %v255_v50 = vsel %vm179_vm0, %v1038_v48, 0.0  ;;  %v1048_v52 = vld [vmem:[%s915_s15 + $0xd8] sm:$0xff]  ;;  %v279_v10 = vmul.f32 %v924_v2, %v924_v2 }
  0x1e   : > { %1451 = vst [vmem:[#allocation13_spill] sm:$0xff] %v1041_v49  ;;  %v252_v51 = vsel %vm179_vm0, %v1041_v49, 0.0  ;;  %1452 = vst [vmem:[#allocation14_spill] sm:$0xff] %v1048_v52  ;;  %v1051_v53 = vld [vmem:[%s915_s15 + $0xd0] sm:$0xff]  ;;  %v261_v54 = vsel %vm179_vm0, %v1048_v52, 0.0  ;;  %v1058_v56 = vld [vmem:[%s915_s15 + $0xe8] sm:$0xff]  ;;  %v278_v11 = vmul.f32 %v918_v0, %v918_v0 }
  0x1f   : > { %v258_v55 = vsel %vm179_vm0, %v1051_v53, 0.0  ;;  %v1061_v57 = vld [vmem:[%s915_s15 + $0xe0] sm:$0xff]  ;;  %v267_v58 = vsel %vm179_vm0, %v1058_v56, 0.0  ;;  %v1068_v60 = vld [vmem:[%s915_s15 + $0xf8] sm:$0xff]  ;;  %v1071_v61 = vld [vmem:[%s915_s15 + $0xf0] sm:$0xff]  ;;  %v311_v6 = vsel %vm179_vm0, %v277_v3, 0.0  ;;  %v293_v3 = vmul.f32 %v998_v32, %v998_v32 }
  0x20   : > { %v264_v59 = vsel %vm179_vm0, %v1061_v57, 0.0  ;;  %v273_v62 = vsel %vm179_vm0, %v1068_v60, 0.0  ;;  %v270_v63 = vsel %vm179_vm0, %v1071_v61, 0.0  ;;  %v308_v7 = vsel %vm179_vm0, %v276_v4, 0.0 }
  0x21   : > { %202 = vadd.xlane.f32.xlu1 %v201_v14  ;;  %199 = vadd.xlane.f32.xlu0 %v198_v15  ;;  %v317_v14 = vsel %vm179_vm0, %v279_v10, 0.0  ;;  %v314_v15 = vsel %vm179_vm0, %v278_v11, 0.0  ;;  %v292_v4 = vmul.f32 %v1001_v33, %v1001_v33  ;;  %v295_v10 = vmul.f32 %v1008_v36, %v1008_v36 }
  0x22   : > { %v294_v11 = vmul.f32 %v1011_v37, %v1011_v37 }
  0x25   : > { %208 = vadd.xlane.f32.xlu1 %v207_v18  ;;  %205 = vadd.xlane.f32.xlu0 %v204_v19  ;;  %v281_v18 = vmul.f32 %v938_v8, %v938_v8  ;;  %v280_v19 = vmul.f32 %v941_v9, %v941_v9 }
  0x29   : > { %214 = vadd.xlane.f32.xlu1 %v213_v22  ;;  %211 = vadd.xlane.f32.xlu0 %v210_v23  ;;  %v323_v22 = vsel %vm179_vm0, %v281_v18, 0.0  ;;  %v320_v23 = vsel %vm179_vm0, %v280_v19, 0.0  ;;  %v297_v18 = vmul.f32 %v1018_v40, %v1018_v40  ;;  %v296_v19 = vmul.f32 %v1021_v41, %v1021_v41 }
  0x2d   : > { %220 = vadd.xlane.f32.xlu1 %v219_v26  ;;  %217 = vadd.xlane.f32.xlu0 %v216_v27  ;;  %v283_v26 = vmul.f32 %v948_v12, %v948_v12  ;;  %v282_v27 = vmul.f32 %v951_v13, %v951_v13 }
  0x31   : > { %226 = vadd.xlane.f32.xlu1 %v225_v30  ;;  %223 = vadd.xlane.f32.xlu0 %v222_v31  ;;  %v329_v30 = vsel %vm179_vm0, %v283_v26, 0.0  ;;  %v326_v31 = vsel %vm179_vm0, %v282_v27, 0.0  ;;  %v299_v26 = vmul.f32 %v1028_v44, %v1028_v44  ;;  %v298_v27 = vmul.f32 %v1031_v45, %v1031_v45 }
  0x35   : > { %232 = vadd.xlane.f32.xlu1 %v231_v34  ;;  %229 = vadd.xlane.f32.xlu0 %v228_v35  ;;  %v285_v34 = vmul.f32 %v958_v16, %v958_v16  ;;  %v284_v35 = vmul.f32 %v961_v17, %v961_v17 }
  0x39   : > { %238 = vadd.xlane.f32.xlu1 %v237_v38  ;;  %235 = vadd.xlane.f32.xlu0 %v234_v39  ;;  %v335_v38 = vsel %vm179_vm0, %v285_v34, 0.0  ;;  %v332_v39 = vsel %vm179_vm0, %v284_v35, 0.0  ;;  %v301_v34 = vmul.f32 %v1038_v48, %v1038_v48  ;;  %v300_v35 = vmul.f32 %v1041_v49, %v1041_v49 }
  0x3d   : > { %244 = vadd.xlane.f32.xlu1 %v243_v42  ;;  %241 = vadd.xlane.f32.xlu0 %v240_v43  ;;  %v287_v42 = vmul.f32 %v968_v20, %v968_v20  ;;  %v286_v43 = vmul.f32 %v971_v21, %v971_v21 }
  0x41   : > { %250 = vadd.xlane.f32.xlu1 %v249_v46  ;;  %247 = vadd.xlane.f32.xlu0 %v246_v47  ;;  %v341_v46 = vsel %vm179_vm0, %v287_v42, 0.0  ;;  %v338_v47 = vsel %vm179_vm0, %v286_v43, 0.0  ;;  %v303_v42 = vmul.f32 %v1048_v52, %v1048_v52  ;;  %v302_v43 = vmul.f32 %v1051_v53, %v1051_v53 }
  0x42   : > { %v307_v53 = vmul.f32 %v1068_v60, %v1068_v60 }
  0x45   : > { %256 = vadd.xlane.f32.xlu1 %v255_v50  ;;  %253 = vadd.xlane.f32.xlu0 %v252_v51  ;;  %v289_v50 = vmul.f32 %v978_v24, %v978_v24  ;;  %v288_v51 = vmul.f32 %v981_v25, %v981_v25 }
  0x49   : > { %262 = vadd.xlane.f32.xlu1 %v261_v54  ;;  %259 = vadd.xlane.f32.xlu0 %v258_v55  ;;  %v347_v54 = vsel %vm179_vm0, %v289_v50, 0.0  ;;  %v344_v55 = vsel %vm179_vm0, %v288_v51, 0.0  ;;  %v305_v50 = vmul.f32 %v1058_v56, %v1058_v56  ;;  %v304_v51 = vmul.f32 %v1061_v57, %v1061_v57 }
  0x4d   : > { %268 = vadd.xlane.f32.xlu1 %v267_v58  ;;  %265 = vadd.xlane.f32.xlu0 %v264_v59  ;;  %v291_v58 = vmul.f32 %v988_v28, %v988_v28  ;;  %v290_v59 = vmul.f32 %v991_v29, %v991_v29 }
  0x51   : > { %274 = vadd.xlane.f32.xlu1 %v273_v62  ;;  %271 = vadd.xlane.f32.xlu0 %v270_v63  ;;  %v353_v62 = vsel %vm179_vm0, %v291_v58, 0.0  ;;  %v350_v63 = vsel %vm179_vm0, %v290_v59, 0.0  ;;  %v306_v58 = vmul.f32 %v1071_v61, %v1071_v61  ;;  %v401_v59 = vsel %vm179_vm0, %v307_v53, 0.0 }
  0x53   : > { %v398_v56 = vsel %vm179_vm0, %v306_v58, 0.0 }
  0x55   : > { %312 = vadd.xlane.f32.xlu1 %v311_v6  ;;  %309 = vadd.xlane.f32.xlu0 %v308_v7  ;;  %v359_v6 = vsel %vm179_vm0, %v293_v3, 0.0  ;;  %v356_v7 = vsel %vm179_vm0, %v292_v4, 0.0 }
  0x59   : > { %318 = vadd.xlane.f32.xlu1 %v317_v14  ;;  %315 = vadd.xlane.f32.xlu0 %v314_v15  ;;  %v365_v14 = vsel %vm179_vm0, %v295_v10, 0.0  ;;  %v362_v15 = vsel %vm179_vm0, %v294_v11, 0.0 }
  0x5d   : > { %324 = vadd.xlane.f32.xlu1 %v323_v22  ;;  %321 = vadd.xlane.f32.xlu0 %v320_v23  ;;  %v371_v22 = vsel %vm179_vm0, %v297_v18, 0.0  ;;  %v368_v23 = vsel %vm179_vm0, %v296_v19, 0.0 }
  0x61   : > { %330 = vadd.xlane.f32.xlu1 %v329_v30  ;;  %327 = vadd.xlane.f32.xlu0 %v326_v31  ;;  %v377_v30 = vsel %vm179_vm0, %v299_v26, 0.0  ;;  %v374_v31 = vsel %vm179_vm0, %v298_v27, 0.0 }
  0x65   : > { %336 = vadd.xlane.f32.xlu1 %v335_v38  ;;  %333 = vadd.xlane.f32.xlu0 %v332_v39  ;;  %v383_v38 = vsel %vm179_vm0, %v301_v34, 0.0  ;;  %v380_v39 = vsel %vm179_vm0, %v300_v35, 0.0 }
  0x69   : > { %342 = vadd.xlane.f32.xlu1 %v341_v46  ;;  %339 = vadd.xlane.f32.xlu0 %v338_v47  ;;  %v389_v46 = vsel %vm179_vm0, %v303_v42, 0.0  ;;  %v386_v47 = vsel %vm179_vm0, %v302_v43, 0.0 }
  0x6d   : > { %348 = vadd.xlane.f32.xlu1 %v347_v54  ;;  %345 = vadd.xlane.f32.xlu0 %v344_v55  ;;  %v395_v54 = vsel %vm179_vm0, %v305_v50, 0.0  ;;  %v392_v55 = vsel %vm179_vm0, %v304_v51, 0.0 }
  0x71   : > { %354 = vadd.xlane.f32.xlu1 %v353_v62  ;;  %351 = vadd.xlane.f32.xlu0 %v350_v63 }
  0x75   : > { %360 = vadd.xlane.f32.xlu1 %v359_v6  ;;  %357 = vadd.xlane.f32.xlu0 %v356_v7 }
  0x79   : > { %366 = vadd.xlane.f32.xlu1 %v365_v14  ;;  %363 = vadd.xlane.f32.xlu0 %v362_v15 }
  0x7d   : > { %372 = vadd.xlane.f32.xlu1 %v371_v22  ;;  %369 = vadd.xlane.f32.xlu0 %v368_v23 }
  0x81   : > { %378 = vadd.xlane.f32.xlu1 %v377_v30  ;;  %375 = vadd.xlane.f32.xlu0 %v374_v31 }
  0x85   : > { %384 = vadd.xlane.f32.xlu1 %v383_v38  ;;  %381 = vadd.xlane.f32.xlu0 %v380_v39 }
  0x89   : > { %390 = vadd.xlane.f32.xlu1 %v389_v46  ;;  %387 = vadd.xlane.f32.xlu0 %v386_v47 }
  0x8d   : > { %396 = vadd.xlane.f32.xlu1 %v395_v54  ;;  %393 = vadd.xlane.f32.xlu0 %v392_v55 }
  0x91   : > { %402 = vadd.xlane.f32.xlu1 %v401_v59  ;;  %399 = vadd.xlane.f32.xlu0 %v398_v56 }
  0xa2   : > { %v188_v57 = vpop.xlane.xlu1 %187  ;;  %v182_v62 = vpop.xlane.xlu0 %181 }
  0xa3   : > { %v404_v55 = vmul.f32 0.020833334, %v182_v62  ;;  %v406_v58 = vmul.f32 0.020833334, %v188_v57 }
  0xa5   : > { %v468_v41 = vmul.f32 %v404_v55, %v404_v55  ;;  %v470_v33 = vmul.f32 %v406_v58, %v406_v58 }
  0xa6   : > { %v191_v63 = vpop.xlane.xlu1 %190  ;;  %v185_v3 = vpop.xlane.xlu0 %184 }
  0xa7   : > { %v405_v53 = vmul.f32 0.020833334, %v185_v3  ;;  %v407_v59 = vmul.f32 0.020833334, %v191_v63 }
  0xa9   : > { %v469_v40 = vmul.f32 %v405_v53, %v405_v53  ;;  %v471_v32 = vmul.f32 %v407_v59, %v407_v59 }
  0xaa   : > { %v197_v4 = vpop.xlane.xlu1 %196  ;;  %v194_v6 = vpop.xlane.xlu0 %193 }
  0xab   : > { %v409_v56 = vmul.f32 0.020833334, %v197_v4  ;;  %v408_v52 = vmul.f32 0.020833334, %v194_v6 }
  0xad   : > { %v472_v28 = vmul.f32 %v408_v52, %v408_v52 }
  0xae   : > { %v203_v7 = vpop.xlane.xlu1 %202  ;;  %v200_v10 = vpop.xlane.xlu0 %199 }
  0xaf   : > { %v411_v49 = vmul.f32 0.020833334, %v203_v7  ;;  %v410_v48 = vmul.f32 0.020833334, %v200_v10 }
  0xb1   : > { %v475_v3 = vmul.f32 %v411_v49, %v411_v49  ;;  %v474_v57 = vmul.f32 %v410_v48, %v410_v48 }
  0xb2   : > { %v209_v60 = vpop.xlane.xlu1 %208  ;;  %v206_v11 = vpop.xlane.xlu0 %205 }
  0xb3   : > { %v413_v29 = vmul.f32 0.020833334, %v209_v60  ;;  %v412_v63 = vmul.f32 0.020833334, %v206_v11 }
  0xb5   : > { %v1205_v53 = vmul.f32 %v413_v29, %v413_v29 }
  0xb6   : > { %v215_v14 = vpop.xlane.xlu1 %214  ;;  %v212_v61 = vpop.xlane.xlu0 %211 }
  0xb7   : > { %v415_v4 = vmul.f32 0.020833334, %v215_v14 }
  0xba   : > { %v221_v15 = vpop.xlane.xlu1 %220  ;;  %v218_v18 = vpop.xlane.xlu0 %217 }
  0xbb   : > { %v416_v58 = vmul.f32 0.020833334, %v218_v18 }
  0xbe   : > { %v227_v19 = vpop.xlane.xlu1 %226  ;;  %v224_v22 = vpop.xlane.xlu0 %223 }
  0xbf   : > { %v418_v48 = vmul.f32 0.020833334, %v224_v22 }
  0xc2   : > { %v1173_v23 = vpop.xlane.xlu1 %232  ;;  %v1175_v26 = vpop.xlane.xlu0 %229 }
  0xc3   : > { %v421_v22 = vmul.f32 0.020833334, %v1173_v23 }
  0xc6   : > { %v1177_v27 = vpop.xlane.xlu1 %238  ;;  %v1179_v30 = vpop.xlane.xlu0 %235 }
  0xca   : > { %v1181_v31 = vpop.xlane.xlu1 %244  ;;  %v1183_v34 = vpop.xlane.xlu0 %241 }
  0xcb   : > { %v424_v23 = vmul.f32 0.020833334, %v1183_v34 }
  0xce   : > { %v1185_v35 = vpop.xlane.xlu1 %250  ;;  %v1187_v38 = vpop.xlane.xlu0 %247 }
  0xd2   : > { %v1189_v39 = vpop.xlane.xlu1 %256  ;;  %v1191_v42 = vpop.xlane.xlu0 %253 }
  0xd6   : > { %v1193_v43 = vpop.xlane.xlu1 %262  ;;  %v1195_v46 = vpop.xlane.xlu0 %259 }
  0xda   : > { %v1197_v47 = vpop.xlane.xlu1 %268  ;;  %v1199_v50 = vpop.xlane.xlu0 %265 }
  0xdb   : > { %1453 = vst [vmem:[#allocation15_spill] sm:$0xff] %v1197_v47  ;;  %1454 = vst [vmem:[#allocation16_spill] sm:$0xff] %v1199_v50 }
  0xde   : > { %v1201_v51 = vpop.xlane.xlu1 %274  ;;  %v1203_v54 = vpop.xlane.xlu0 %271 }
  0xdf   : > { %1455 = vst [vmem:[#allocation17_spill] sm:$0xff] %v1201_v51  ;;  %1456 = vst [vmem:[#allocation18_spill] sm:$0xff] %v1203_v54  ;;  %v473_v51 = vmul.f32 %v409_v56, %v409_v56 }
  0xe2   : > { %v313_v45 = vpop.xlane.xlu1 %312  ;;  %v310_v44 = vpop.xlane.xlu0 %309 }
  0xe3   : > { %v437_v37 = vmul.f32 0.020833334, %v313_v45  ;;  %v436_v36 = vmul.f32 0.020833334, %v310_v44  ;;  %v414_v44 = vmul.f32 0.020833334, %v212_v61 }
  0xe4   : > { %v417_v45 = vmul.f32 0.020833334, %v221_v15 }
  0xe5   : > { %v501_v54 = vsub.f32 %v437_v37, %v469_v40  ;;  %v500_v62 = vsub.f32 %v436_v36, %v468_v41  ;;  %v1207_v36 = vmul.f32 %v412_v63, %v412_v63  ;;  %v1209_v40 = vmul.f32 %v415_v4, %v415_v4 }
  0xe6   : > { %v319_v6 = vpop.xlane.xlu1 %318  ;;  %v316_v7 = vpop.xlane.xlu0 %315  ;;  %v419_v41 = vmul.f32 0.020833334, %v227_v19  ;;  %v1211_v56 = vmul.f32 %v414_v44, %v414_v44  ;;  %v1213_v61 = vmul.f32 %v417_v45, %v417_v45  ;;  %v1219_v19 = vmul.f32 %v418_v48, %v418_v48 }
  0xe7   : > { %v533_v10 = vmax.f32 %v501_v54, 0.0  ;;  %v532_v50 = vmax.f32 %v500_v62, 0.0  ;;  %v439_v47 = vmul.f32 0.020833334, %v319_v6  ;;  %v438_v55 = vmul.f32 0.020833334, %v316_v7 }
  0xe8   : > { %v423_v44 = vmul.f32 0.020833334, %v1177_v27 }
  0xe9   : > { %v565_v60 = vadd.f32 1e-05, %v533_v10  ;;  %v564_v59 = vadd.f32 1e-05, %v532_v50  ;;  %v503_v52 = vsub.f32 %v439_v47, %v471_v32  ;;  %v502_v37 = vsub.f32 %v438_v55, %v470_v33 }
  0xea   : > { %v325_v49 = vpop.xlane.xlu1 %324  ;;  %v322_v11 = vpop.xlane.xlu0 %321  ;;  %v1215_v32 = vmul.f32 %v416_v58, %v416_v58  ;;  %v1217_v50 = vmul.f32 %v419_v41, %v419_v41  ;;  %v420_v55 = vmul.f32 0.020833334, %v1175_v26 }
  0xeb   : > { %807 = vrsqrt.f32 %v565_v60  ;;  %v535_v14 = vmax.f32 %v503_v52, 0.0  ;;  %v534_v54 = vmax.f32 %v502_v37, 0.0  ;;  %v441_v29 = vmul.f32 0.020833334, %v325_v49 }
  0xec   : > { %809 = vrsqrt.f32 %v564_v59  ;;  %v440_v15 = vmul.f32 0.020833334, %v322_v11  ;;  %v1225_v52 = vmul.f32 %v421_v22, %v421_v22  ;;  %v1229_v11 = vmul.f32 %v420_v55, %v420_v55 }
  0xed   : > { %v567_v33 = vadd.f32 1e-05, %v535_v14  ;;  %v566_v18 = vadd.f32 1e-05, %v534_v54  ;;  %v505_v47 = vsub.f32 %v441_v29, %v473_v51  ;;  %v422_v51 = vmul.f32 0.020833334, %v1179_v30 }
  0xee   : > { %v504_v62 = vsub.f32 %v440_v15, %v472_v28  ;;  %v331_v63 = vpop.xlane.xlu1 %330  ;;  %v328_v4 = vpop.xlane.xlu0 %327  ;;  %v425_v28 = vmul.f32 0.020833334, %v1181_v31  ;;  %v1231_v14 = vmul.f32 %v423_v44, %v423_v44  ;;  %v1238_v31 = vld [vmem:[%s1425_s1] ss:$0 sm:$0xff]  ;;  %v427_v55 = vmul.f32 0.020833334, %v1185_v35 }
  0xef   : > { %811 = vrsqrt.f32 %v567_v33  ;;  %v537_v6 = vmax.f32 %v505_v47, 0.0  ;;  %v443_v7 = vmul.f32 0.020833334, %v331_v63  ;;  %v442_v10 = vmul.f32 0.020833334, %v328_v4 }
  0xf0   : > { %813 = vrsqrt.f32 %v566_v18  ;;  %v536_v45 = vmax.f32 %v504_v62, 0.0  ;;  %v1241_v33 = vmul.f32 %v425_v28, %v425_v28  ;;  %v1243_v18 = vmul.f32 %v424_v23, %v424_v23 }
  0xf1   : > { %v569_v58 = vadd.f32 1e-05, %v537_v6  ;;  %v507_v60 = vsub.f32 %v443_v7, %v475_v3  ;;  %v506_v59 = vsub.f32 %v442_v10, %v474_v57  ;;  %v1233_v57 = vmul.f32 %v422_v51, %v422_v51 }
  0xf2   : > { %v568_v37 = vadd.f32 1e-05, %v536_v45  ;;  %v337_v41 = vpop.xlane.xlu1 %336  ;;  %v334_v48 = vpop.xlane.xlu0 %333 }
  0xf3   : > { %815 = vrsqrt.f32 %v569_v58  ;;  %v539_v26 = vmax.f32 %v507_v60, 0.0  ;;  %v538_v49 = vmax.f32 %v506_v59, 0.0  ;;  %v445_v27 = vmul.f32 0.020833334, %v337_v41 }
  0xf4   : > { %817 = vrsqrt.f32 %v568_v37  ;;  %v444_v30 = vmul.f32 0.020833334, %v334_v48 }
  0xf5   : > { %v808_v3 = vpop.eup %807  ;;  %v571_v34 = vadd.f32 1e-05, %v539_v26  ;;  %v570_v54 = vadd.f32 1e-05, %v538_v49  ;;  %v509_v29 = vsub.f32 %v445_v27, %v1205_v53  ;;  %v1268_v49 = vmul.f32 %v427_v55, %v427_v55 }
  0xf6   : > { %v810_v15 = vpop.eup %809  ;;  %v629_v47 = vmul.f32 %v808_v3, %v931_v5  ;;  %v508_v22 = vsub.f32 %v444_v30, %v1207_v36  ;;  %v343_v62 = vpop.xlane.xlu1 %342 }
  0xf7   : > { %v340_v63 = vpop.xlane.xlu0 %339  ;;  %v628_v53 = vmul.f32 %v810_v15, %v921_v1  ;;  %819 = vrsqrt.f32 %v571_v34  ;;  %v541_v4 = vmax.f32 %v509_v29, 0.0  ;;  %v447_v6 = vmul.f32 0.020833334, %v343_v62 }
  0xf8   : > { %v668_v7 = vmul.f32 %v1238_v31, %v629_v47  ;;  %821 = vrsqrt.f32 %v570_v54  ;;  %v540_v5 = vmax.f32 %v508_v22, 0.0  ;;  %v446_v36 = vmul.f32 0.020833334, %v340_v63 }
  0xf9   : > { %v812_v10 = vpop.eup %811  ;;  %v667_v44 = vmul.f32 %v1238_v31, %v628_v53  ;;  %v573_v45 = vadd.f32 1e-05, %v541_v4  ;;  %v511_v51 = vsub.f32 %v447_v6, %v1209_v40  ;;  %v426_v1 = vmul.f32 0.020833334, %v1187_v38 }
  0xfa   : > { %v814_v58 = vpop.eup %813  ;;  %700 = vst.msk [vmem:[%s1252_s20 + $0x8] sm:$0xff] %vm179_vm0, %v668_v7  ;;  %v631_v60 = vmul.f32 %v812_v10, %v924_v2  ;;  %v572_v59 = vadd.f32 1e-05, %v540_v5  ;;  %v510_v28 = vsub.f32 %v446_v36, %v1211_v56  ;;  %v349_v23 = vpop.xlane.xlu1 %348  ;;  %v429_v6 = vmul.f32 0.020833334, %v1189_v39 }
  0xfb   : > { %v346_v37 = vpop.xlane.xlu0 %345  ;;  %699 = vst.msk [vmem:[%s1252_s20] sm:$0xff] %vm179_vm0, %v667_v44  ;;  %v630_v35 = vmul.f32 %v814_v58, %v918_v0  ;;  %823 = vrsqrt.f32 %v573_v45  ;;  %v543_v41 = vmax.f32 %v511_v51, 0.0  ;;  %v449_v40 = vmul.f32 0.020833334, %v349_v23 }
  0xfc   : > { %v670_v48 = vmul.f32 %v1238_v31, %v631_v60  ;;  %825 = vrsqrt.f32 %v572_v59  ;;  %v542_v38 = vmax.f32 %v510_v28, 0.0  ;;  %v448_v26 = vmul.f32 0.020833334, %v346_v37 }
  0xfd   : > { %v816_v2 = vpop.eup %815  ;;  %v669_v56 = vmul.f32 %v1238_v31, %v630_v35  ;;  %v575_v27 = vadd.f32 1e-05, %v543_v41  ;;  %v513_v30 = vsub.f32 %v449_v40, %v1213_v61  ;;  %v1272_v34 = vmul.f32 %v426_v1, %v426_v1 }
  0xfe   : > { %v818_v3 = vpop.eup %817  ;;  %702 = vst.msk [vmem:[%s1252_s20 + $0x18] sm:$0xff] %vm179_vm0, %v670_v48  ;;  %v633_v0 = vmul.f32 %v816_v2, %v938_v8  ;;  %v574_v54 = vadd.f32 1e-05, %v542_v38  ;;  %v512_v29 = vsub.f32 %v448_v26, %v1215_v32  ;;  %v355_v15 = vpop.xlane.xlu1 %354  ;;  %v1294_v59 = vmul.f32 %v429_v6, %v429_v6 }
  0xff   : > { %v352_v47 = vpop.xlane.xlu0 %351  ;;  %701 = vst.msk [vmem:[%s1252_s20 + $0x10] sm:$0xff] %vm179_vm0, %v669_v56  ;;  %v632_v22 = vmul.f32 %v818_v3, %v941_v9  ;;  %827 = vrsqrt.f32 %v575_v27  ;;  %v545_v62 = vmax.f32 %v513_v30, 0.0  ;;  %v451_v61 = vmul.f32 0.020833334, %v355_v15 }
 0x100   : > { %v672_v63 = vmul.f32 %v1238_v31, %v633_v0  ;;  %829 = vrsqrt.f32 %v574_v54  ;;  %v544_v53 = vmax.f32 %v512_v29, 0.0  ;;  %v450_v4 = vmul.f32 0.020833334, %v352_v47 }
 0x101   : > { %v820_v8 = vpop.eup %819  ;;  %v671_v32 = vmul.f32 %v1238_v31, %v632_v22  ;;  %v577_v7 = vadd.f32 1e-05, %v545_v62  ;;  %v515_v5 = vsub.f32 %v451_v61, %v1217_v50  ;;  %v428_v9 = vmul.f32 0.020833334, %v1191_v42 }
 0x102   : > { %v822_v36 = vpop.eup %821  ;;  %704 = vst.msk [vmem:[%s1252_s20 + $0x28] sm:$0xff] %vm179_vm0, %v672_v63  ;;  %v635_v10 = vmul.f32 %v820_v8, %v948_v12  ;;  %v576_v55 = vadd.f32 1e-05, %v544_v53  ;;  %v514_v44 = vsub.f32 %v450_v4, %v1219_v19  ;;  %v361_v45 = vpop.xlane.xlu1 %360  ;;  %v431_v3 = vmul.f32 0.020833334, %v1193_v43 }
 0x103   : > { %v358_v51 = vpop.xlane.xlu0 %357  ;;  %703 = vst.msk [vmem:[%s1252_s20 + $0x20] sm:$0xff] %vm179_vm0, %v671_v32  ;;  %v634_v39 = vmul.f32 %v822_v36, %v951_v13  ;;  %831 = vrsqrt.f32 %v577_v7  ;;  %v547_v58 = vmax.f32 %v515_v5, 0.0  ;;  %v453_v50 = vmul.f32 0.020833334, %v361_v45 }
 0x104   : > { %v674_v1 = vmul.f32 %v1238_v31, %v635_v10  ;;  %833 = vrsqrt.f32 %v576_v55  ;;  %v546_v42 = vmax.f32 %v514_v44, 0.0  ;;  %v452_v60 = vmul.f32 0.020833334, %v358_v51 }
 0x105   : > { %v824_v12 = vpop.eup %823  ;;  %v673_v19 = vmul.f32 %v1238_v31, %v634_v39  ;;  %v579_v28 = vadd.f32 1e-05, %v547_v58  ;;  %v517_v23 = vsub.f32 %v453_v50, %v1225_v52  ;;  %v1298_v35 = vmul.f32 %v428_v9, %v428_v9  ;;  %v1457_v50 = vld [vmem:[#allocation15_spill] sm:$0xff] }
 0x106   : > { %v826_v37 = vpop.eup %825  ;;  %706 = vst.msk [vmem:[%s1252_s20 + $0x38] sm:$0xff] %vm179_vm0, %v674_v1  ;;  %v637_v13 = vmul.f32 %v824_v12, %v958_v16  ;;  %v578_v41 = vadd.f32 1e-05, %v546_v42  ;;  %v516_v40 = vsub.f32 %v452_v60, %v1229_v11  ;;  %v367_v48 = vpop.xlane.xlu1 %366  ;;  %v1320_v8 = vmul.f32 %v431_v3, %v431_v3 }
 0x107   : > { %v364_v38 = vpop.xlane.xlu0 %363  ;;  %705 = vst.msk [vmem:[%s1252_s20 + $0x30] sm:$0xff] %vm179_vm0, %v673_v19  ;;  %v636_v26 = vmul.f32 %v826_v37, %v961_v17  ;;  %835 = vrsqrt.f32 %v579_v28  ;;  %v549_v2 = vmax.f32 %v517_v23, 0.0  ;;  %v455_v52 = vmul.f32 0.020833334, %v367_v48  ;;  %v1458_v19 = vld [vmem:[#allocation16_spill] sm:$0xff]  ;;  %v1459_v28 = vld [vmem:[#allocation2_spill] sm:$0xff] }
 0x108   : > { %v676_v56 = vmul.f32 %v1238_v31, %v637_v13  ;;  %837 = vrsqrt.f32 %v578_v41  ;;  %v548_v27 = vmax.f32 %v516_v40, 0.0  ;;  %v454_v30 = vmul.f32 0.020833334, %v364_v38  ;;  %v1460_v48 = vld [vmem:[#allocation3_spill] sm:$0xff] }
 0x109   : > { %v828_v16 = vpop.eup %827  ;;  %v675_v11 = vmul.f32 %v1238_v31, %v636_v26  ;;  %v581_v0 = vadd.f32 1e-05, %v549_v2  ;;  %v519_v54 = vsub.f32 %v455_v52, %v1231_v14  ;;  %v430_v17 = vmul.f32 0.020833334, %v1195_v46 }
 0x10a   : > { %v830_v29 = vpop.eup %829  ;;  %708 = vst.msk [vmem:[%s1252_s20 + $0x48] sm:$0xff] %vm179_vm0, %v676_v56  ;;  %v639_v15 = vmul.f32 %v828_v16, %v968_v20  ;;  %v580_v47 = vadd.f32 1e-05, %v548_v27  ;;  %v518_v22 = vsub.f32 %v454_v30, %v1233_v57  ;;  %v373_v62 = vpop.xlane.xlu1 %372  ;;  %v433_v1 = vmul.f32 0.020833334, %v1457_v50 }
 0x10b   : > { %v370_v61 = vpop.xlane.xlu0 %369  ;;  %707 = vst.msk [vmem:[%s1252_s20 + $0x40] sm:$0xff] %vm179_vm0, %v675_v11  ;;  %v638_v43 = vmul.f32 %v830_v29, %v971_v21  ;;  %839 = vrsqrt.f32 %v581_v0  ;;  %v551_v63 = vmax.f32 %v519_v54, 0.0  ;;  %v457_v14 = vmul.f32 0.020833334, %v373_v62  ;;  %v1461_v54 = vld [vmem:[#allocation4_spill] sm:$0xff]  ;;  %v1462_v62 = vld [vmem:[#allocation5_spill] sm:$0xff] }
 0x10c   : > { %v678_v53 = vmul.f32 %v1238_v31, %v639_v15  ;;  %841 = vrsqrt.f32 %v580_v47  ;;  %v550_v46 = vmax.f32 %v518_v22, 0.0  ;;  %v456_v4 = vmul.f32 0.020833334, %v370_v61 }
 0x10d   : > { %v832_v20 = vpop.eup %831  ;;  %v677_v57 = vmul.f32 %v1238_v31, %v638_v43  ;;  %v583_v6 = vadd.f32 1e-05, %v551_v63  ;;  %v521_v32 = vsub.f32 %v457_v14, %v1241_v33  ;;  %v1324_v5 = vmul.f32 %v430_v17, %v430_v17 }
 0x10e   : > { %v834_v7 = vpop.eup %833  ;;  %710 = vst.msk [vmem:[%s1252_s20 + $0x58] sm:$0xff] %vm179_vm0, %v678_v53  ;;  %v641_v21 = vmul.f32 %v832_v20, %v978_v24  ;;  %v582_v36 = vadd.f32 1e-05, %v550_v46  ;;  %v520_v9 = vsub.f32 %v456_v4, %v1243_v18  ;;  %v379_v10 = vpop.xlane.xlu1 %378  ;;  %v497_v30 = vmul.f32 %v433_v1, %v433_v1  ;;  %v1463_v4 = vld [vmem:[#allocation17_spill] sm:$0xff] }
 0x10f   : > { %v376_v55 = vpop.xlane.xlu0 %375  ;;  %709 = vst.msk [vmem:[%s1252_s20 + $0x50] sm:$0xff] %vm179_vm0, %v677_v57  ;;  %v640_v44 = vmul.f32 %v834_v7, %v981_v25  ;;  %843 = vrsqrt.f32 %v583_v6  ;;  %v553_v45 = vmax.f32 %v521_v32, 0.0  ;;  %v459_v33 = vmul.f32 0.020833334, %v379_v10  ;;  %v1464_v7 = vld [vmem:[#allocation18_spill] sm:$0xff] }
 0x110   : > { %v680_v51 = vmul.f32 %v1238_v31, %v641_v21  ;;  %845 = vrsqrt.f32 %v582_v36  ;;  %v552_v39 = vmax.f32 %v520_v9, 0.0  ;;  %v458_v58 = vmul.f32 0.020833334, %v376_v55  ;;  %v1465_v36 = vld [vmem:[#allocation6_spill] sm:$0xff] }
 0x111   : > { %v836_v24 = vpop.eup %835  ;;  %v679_v18 = vmul.f32 %v1238_v31, %v640_v44  ;;  %v585_v42 = vadd.f32 1e-05, %v553_v45  ;;  %v523_v60 = vsub.f32 %v459_v33, %v1268_v49  ;;  %v432_v25 = vmul.f32 0.020833334, %v1458_v19  ;;  %v1466_v33 = vld [vmem:[#allocation7_spill] sm:$0xff] }
 0x112   : > { %v838_v12 = vpop.eup %837  ;;  %712 = vst.msk [vmem:[%s1252_s20 + $0x68] sm:$0xff] %vm179_vm0, %v680_v51  ;;  %v643_v23 = vmul.f32 %v836_v24, %v1459_v28  ;;  %v584_v37 = vadd.f32 1e-05, %v552_v39  ;;  %v522_v13 = vsub.f32 %v458_v58, %v1272_v34  ;;  %v385_v41 = vpop.xlane.xlu1 %384  ;;  %v435_v20 = vmul.f32 0.020833334, %v1463_v4 }
 0x113   : > { %v382_v40 = vpop.xlane.xlu0 %381  ;;  %711 = vst.msk [vmem:[%s1252_s20 + $0x60] sm:$0xff] %vm179_vm0, %v679_v18  ;;  %v642_v38 = vmul.f32 %v838_v12, %v1460_v48  ;;  %847 = vrsqrt.f32 %v585_v42  ;;  %v555_v26 = vmax.f32 %v523_v60, 0.0  ;;  %v461_v49 = vmul.f32 0.020833334, %v385_v41 }
 0x114   : > { %v682_v2 = vmul.f32 %v1238_v31, %v643_v23  ;;  %849 = vrsqrt.f32 %v584_v37  ;;  %v554_v52 = vmax.f32 %v522_v13, 0.0  ;;  %v460_v56 = vmul.f32 0.020833334, %v382_v40  ;;  %v1468_v40 = vld [vmem:[#allocation9_spill] sm:$0xff] }
 0x115   : > { %v840_v27 = vpop.eup %839  ;;  %v681_v34 = vmul.f32 %v1238_v31, %v642_v38  ;;  %v587_v16 = vadd.f32 1e-05, %v555_v26  ;;  %v525_v3 = vsub.f32 %v461_v49, %v1294_v59  ;;  %v496_v0 = vmul.f32 %v432_v25, %v432_v25  ;;  %v1467_v25 = vld [vmem:[#allocation8_spill] sm:$0xff] }
 0x116   : > { %v842_v11 = vpop.eup %841  ;;  %714 = vst.msk [vmem:[%s1252_s20 + $0x78] sm:$0xff] %vm179_vm0, %v682_v2  ;;  %v645_v29 = vmul.f32 %v840_v27, %v1461_v54  ;;  %v586_v17 = vadd.f32 1e-05, %v554_v52  ;;  %v524_v15 = vsub.f32 %v460_v56, %v1298_v35  ;;  %v391_v47 = vpop.xlane.xlu1 %390  ;;  %v434_v21 = vmul.f32 0.020833334, %v1464_v7 }
 0x117   : > { %v388_v22 = vpop.xlane.xlu0 %387  ;;  %713 = vst.msk [vmem:[%s1252_s20 + $0x70] sm:$0xff] %vm179_vm0, %v681_v34  ;;  %v644_v61 = vmul.f32 %v842_v11, %v1462_v62  ;;  %851 = vrsqrt.f32 %v587_v16  ;;  %v557_v43 = vmax.f32 %v525_v3, 0.0  ;;  %v463_v63 = vmul.f32 0.020833334, %v391_v47  ;;  %v1469_v3 = vld [vmem:[#allocation10_spill] sm:$0xff] }
 0x118   : > { %v684_v59 = vmul.f32 %v1238_v31, %v645_v29  ;;  %853 = vrsqrt.f32 %v586_v17  ;;  %v556_v14 = vmax.f32 %v524_v15, 0.0  ;;  %v462_v53 = vmul.f32 0.020833334, %v388_v22  ;;  %v1470_v29 = vld [vmem:[#allocation11_spill] sm:$0xff] }
 0x119   : > { %v844_v46 = vpop.eup %843  ;;  %v683_v35 = vmul.f32 %v1238_v31, %v644_v61  ;;  %v589_v57 = vadd.f32 1e-05, %v557_v43  ;;  %v527_v6 = vsub.f32 %v463_v63, %v1320_v8  ;;  %v499_v18 = vmul.f32 %v435_v20, %v435_v20 }
 0x11a   : > { %v846_v32 = vpop.eup %845  ;;  %716 = vst.msk [vmem:[%s1252_s20 + $0x88] sm:$0xff] %vm179_vm0, %v684_v59  ;;  %v647_v9 = vmul.f32 %v844_v46, %v1465_v36  ;;  %v588_v10 = vadd.f32 1e-05, %v556_v14  ;;  %v526_v55 = vsub.f32 %v462_v53, %v1324_v5  ;;  %v397_v44 = vpop.xlane.xlu1 %396  ;;  %v498_v19 = vmul.f32 %v434_v21, %v434_v21  ;;  %v1471_v59 = vld [vmem:[#allocation12_spill] sm:$0xff]  ;;  %v1472_v46 = vld [vmem:[#allocation13_spill] sm:$0xff] }
 0x11b   : > { %v394_v45 = vpop.xlane.xlu0 %393  ;;  %715 = vst.msk [vmem:[%s1252_s20 + $0x80] sm:$0xff] %vm179_vm0, %v683_v35  ;;  %v646_v51 = vmul.f32 %v846_v32, %v1466_v33  ;;  %855 = vrsqrt.f32 %v589_v57  ;;  %v559_v39 = vmax.f32 %v527_v6, 0.0  ;;  %v465_v8 = vmul.f32 0.020833334, %v397_v44  ;;  %v1473_v32 = vld [vmem:[#allocation14_spill] sm:$0xff]  ;;  %v871_v21 = vld [vmem:[%s915_s15 + $0xd0] sm:$0xff] }
 0x11c   : > { %v686_v58 = vmul.f32 %v1238_v31, %v647_v9  ;;  %857 = vrsqrt.f32 %v588_v10  ;;  %v558_v24 = vmax.f32 %v526_v55, 0.0  ;;  %v464_v50 = vmul.f32 0.020833334, %v394_v45  ;;  %v872_v45 = vld [vmem:[%s915_s15 + $0xe8] sm:$0xff] }
 0x11d   : > { %v848_v1 = vpop.eup %847  ;;  %v685_v5 = vmul.f32 %v1238_v31, %v646_v51  ;;  %v591_v42 = vadd.f32 1e-05, %v559_v39  ;;  %v529_v60 = vsub.f32 %v465_v8, %v497_v30  ;;  %v873_v51 = vld [vmem:[%s915_s15 + $0xe0] sm:$0xff] }
 0x11e   : > { %v850_v12 = vpop.eup %849  ;;  %718 = vst.msk [vmem:[%s1252_s20 + $0x98] sm:$0xff] %vm179_vm0, %v686_v58  ;;  %v649_v28 = vmul.f32 %v848_v1, %v1467_v25  ;;  %v590_v23 = vadd.f32 1e-05, %v558_v24  ;;  %v528_v37 = vsub.f32 %v464_v50, %v496_v0  ;;  %v403_v13 = vpop.xlane.xlu1 %402  ;;  %v874_v1 = vld [vmem:[%s915_s15 + $0xf8] sm:$0xff] }
 0x11f   : > { %v400_v41 = vpop.xlane.xlu0 %399  ;;  %717 = vst.msk [vmem:[%s1252_s20 + $0x90] sm:$0xff] %vm179_vm0, %v685_v5  ;;  %v648_v48 = vmul.f32 %v850_v12, %v1468_v40  ;;  %859 = vrsqrt.f32 %v591_v42  ;;  %v561_v38 = vmax.f32 %v529_v60, 0.0  ;;  %v467_v26 = vmul.f32 0.020833334, %v403_v13  ;;  %v875_v5 = vld [vmem:[%s915_s15 + $0xf0] sm:$0xff] }
 0x120   : > { %v688_v49 = vmul.f32 %v1238_v31, %v649_v28  ;;  %861 = vrsqrt.f32 %v590_v23  ;;  %v560_v2 = vmax.f32 %v528_v37, 0.0  ;;  %v466_v52 = vmul.f32 0.020833334, %v400_v41 }
 0x121   : > { %v852_v56 = vpop.eup %851  ;;  %v687_v27 = vmul.f32 %v1238_v31, %v648_v48  ;;  %v593_v30 = vadd.f32 1e-05, %v561_v38  ;;  %v531_v34 = vsub.f32 %v467_v26, %v499_v18 }
 0x122   : > { %v854_v16 = vpop.eup %853  ;;  %720 = vst.msk [vmem:[%s1252_s20 + $0xa8] sm:$0xff] %vm179_vm0, %v688_v49  ;;  %v651_v11 = vmul.f32 %v852_v56, %v1469_v3  ;;  %v592_v0 = vadd.f32 1e-05, %v560_v2  ;;  %v530_v54 = vsub.f32 %v466_v52, %v498_v19 }
 0x123   : > { %719 = vst.msk [vmem:[%s1252_s20 + $0xa0] sm:$0xff] %vm179_vm0, %v687_v27  ;;  %v650_v17 = vmul.f32 %v854_v16, %v1470_v29  ;;  %863 = vrsqrt.f32 %v593_v30  ;;  %v563_v15 = vmax.f32 %v531_v34, 0.0 }
 0x124   : > { %v690_v47 = vmul.f32 %v1238_v31, %v651_v11  ;;  %865 = vrsqrt.f32 %v592_v0  ;;  %v562_v22 = vmax.f32 %v530_v54, 0.0 }
 0x125   : > { %v856_v62 = vpop.eup %855  ;;  %v689_v61 = vmul.f32 %v1238_v31, %v650_v17  ;;  %v595_v43 = vadd.f32 1e-05, %v563_v15 }
 0x126   : > { %v858_v63 = vpop.eup %857  ;;  %722 = vst.msk [vmem:[%s1252_s20 + $0xb8] sm:$0xff] %vm179_vm0, %v690_v47  ;;  %v653_v14 = vmul.f32 %v856_v62, %v1471_v59  ;;  %v594_v53 = vadd.f32 1e-05, %v562_v22 }
 0x127   : > { %721 = vst.msk [vmem:[%s1252_s20 + $0xb0] sm:$0xff] %vm179_vm0, %v689_v61  ;;  %v652_v4 = vmul.f32 %v858_v63, %v1472_v46  ;;  %867 = vrsqrt.f32 %v595_v43 }
 0x128   : > { %v692_v20 = vmul.f32 %v1238_v31, %v653_v14  ;;  %869 = vrsqrt.f32 %v594_v53 }
 0x129   : > { %v860_v35 = vpop.eup %859  ;;  %v691_v57 = vmul.f32 %v1238_v31, %v652_v4 }
 0x12a   : > { %v862_v6 = vpop.eup %861  ;;  %724 = vst.msk [vmem:[%s1252_s20 + $0xc8] sm:$0xff] %vm179_vm0, %v692_v20  ;;  %v655_v7 = vmul.f32 %v860_v35, %v1473_v32 }
 0x12b   : > { %723 = vst.msk [vmem:[%s1252_s20 + $0xc0] sm:$0xff] %vm179_vm0, %v691_v57  ;;  %v654_v36 = vmul.f32 %v871_v21, %v862_v6 }
 0x12c   : > { %v694_v9 = vmul.f32 %v1238_v31, %v655_v7 }
 0x12d   : > { %v864_v10 = vpop.eup %863  ;;  %v693_v55 = vmul.f32 %v1238_v31, %v654_v36 }
 0x12e   : > { %v866_v44 = vpop.eup %865  ;;  %726 = vst.msk [vmem:[%s1252_s20 + $0xd8] sm:$0xff] %vm179_vm0, %v694_v9  ;;  %v657_v33 = vmul.f32 %v872_v45, %v864_v10 }
 0x12f   : > { %725 = vst.msk [vmem:[%s1252_s20 + $0xd0] sm:$0xff] %vm179_vm0, %v693_v55  ;;  %v656_v39 = vmul.f32 %v873_v51, %v866_v44 }
 0x130   : > { %v696_v8 = vmul.f32 %v1238_v31, %v657_v33 }
 0x131   : > { %v868_v58 = vpop.eup %867  ;;  %v695_v24 = vmul.f32 %v1238_v31, %v656_v39 }
 0x132   : > { %v870_v50 = vpop.eup %869  ;;  %728 = vst.msk [vmem:[%s1252_s20 + $0xe8] sm:$0xff] %vm179_vm0, %v696_v8  ;;  %v659_v18 = vmul.f32 %v874_v1, %v868_v58 }
 0x133   : > { %727 = vst.msk [vmem:[%s1252_s20 + $0xe0] sm:$0xff] %vm179_vm0, %v695_v24  ;;  %v658_v42 = vmul.f32 %v875_v5, %v870_v50 }
 0x134   : > { %v698_v60 = vmul.f32 %v1238_v31, %v659_v18 }
 0x135   : > { %v697_v12 = vmul.f32 %v1238_v31, %v658_v42 }
 0x136   : > { %730 = vst.msk [vmem:[%s1252_s20 + $0xf8] sm:$0xff] %vm179_vm0, %v698_v60 }
 0x137   : > { %729 = vst.msk [vmem:[%s1252_s20 + $0xf0] sm:$0xff] %vm179_vm0, %v697_v12 }
 0x138 PF: > { %s12_s9 = sadd.s32 1, %s882_s9  }
 0x139   : > { %p9_p4 = scmp.ge.s32.totalorder %s12_s9, 4  }
 0x13b   :  { %11 = sbr.rel (!%p9_p4) target bundleno = 1 (0x1), region = 58 }

</bundles_post_ra>
